<compile_context>
chip_gen: v5e
topology: v5e:2x2
jax: 0.10.0
libtpu: 0.0.40
codegen_flags: <defaults>
</compile_context>

<pallas_src>
import jax
import jax.numpy as jnp
from jax.experimental import pallas as pl
from jax.experimental.pallas import tpu as pltpu

_LANES = 128
_SUBLANES = 8


def _round_up(x, m):
    return ((x + m - 1) // m) * m


def prep_params(w1, b1, w2, b2, param_dtype=None):
    """One-time parameter prep: lane-pad weights, pack biases into one f32 slab.

    w1: [D, D], b1: [D] or [1, D], w2: [D, L], b2: [L] or [1, L].
    Returns (w1_p [D, Dp], bias [2, Wb] f32, w2_p [Dp, Lp]).
    Optionally cast weights to param_dtype (e.g. bf16) for the native MXU path.
    """
    D = w1.shape[0]
    L = w2.shape[1]
    Dp = _round_up(D, _LANES)
    Lp = _round_up(L, _LANES)
    dt1 = param_dtype if param_dtype is not None else w1.dtype
    dt2 = param_dtype if param_dtype is not None else w2.dtype

    w1_p = jnp.zeros((D, Dp), dt1).at[:, :D].set(w1.astype(dt1))
    w2_p = jnp.zeros((Dp, Lp), dt2).at[:D, :L].set(w2.astype(dt2))

    Wb = max(Dp, Lp)
    bias = jnp.zeros((2, Wb), jnp.float32)
    bias = bias.at[0, :D].set(b1.reshape(-1).astype(jnp.float32))
    bias = bias.at[1, :L].set(b2.reshape(-1).astype(jnp.float32))
    return w1_p, bias, w2_p


def head_kernel(x_ref, w1_ref, b_ref, w2_ref, o_ref):
    # x_ref : [tb, D]   row tile of features (hidden dim left unpadded)
    # w1_ref: [D, Dp]   first-layer weight, lane-padded output dim (resident)
    # b_ref : [2, Wb]   row 0 = b1 (zero-padded), row 1 = b2 (zero-padded), f32
    # w2_ref: [Dp, Lp]  second-layer weight, lane-padded both dims (resident)
    # o_ref : [tb, Lp]  lane-dense output tile
    Dp = w1_ref.shape[1]
    Lp = o_ref.shape[1]

    # GEMM1 in the operand dtype (bf16 stays on the native MXU path), f32 accum.
    h = jnp.dot(x_ref[...], w1_ref[...], preferred_element_type=jnp.float32)
    h = jnp.maximum(h + b_ref[0:1, :Dp], 0.0)  # bias + relu in the f32 accumulator
    # TODO(synk): dropout omitted (inference / eval mode => identity).

    # GEMM2: cast hidden back to the weight dtype (no-op for f32), f32 accum.
    out = jnp.dot(h.astype(w2_ref.dtype), w2_ref[...],
                  preferred_element_type=jnp.float32)
    o_ref[...] = (out + b_ref[1:2, :Lp]).astype(o_ref.dtype)


def classification_head_relu(features, w1_p, bias, w2_p, num_labels, *, row_tile=1024):
    """features: [B, D]; params from prep_params(); returns [B, num_labels]."""
    B, D = features.shape
    Dp = w1_p.shape[1]
    Lp = w2_p.shape[1]
    Wb = bias.shape[1]

    # Batch tile: as large as row_tile allows; for larger batches make sure the
    # grid has >= 2 steps so the "parallel" axis can use both v7x TensorCores.
    tb = min(row_tile, _round_up(B, _SUBLANES))
    if B > 2 * _LANES and pl.cdiv(B, tb) < 2:
        tb = _round_up(pl.cdiv(B, 2), _SUBLANES)
    grid = (pl.cdiv(B, tb),)

    # VMEM budget: single-buffered resident weights + double-buffered x / out
    # tiles + f32 intermediate. Only raise the scoped limit when actually needed.
    in_b = jnp.dtype(features.dtype).itemsize
    w_b = jnp.dtype(w1_p.dtype).itemsize
    est = (D * Dp * w_b + Dp * Lp * w_b + 2 * Wb * 4      # resident operands
           + 2 * tb * D * in_b + 2 * tb * Lp * in_b       # pipelined x / out tiles
           + 2 * tb * Dp * 4)                              # f32 intermediate h
    vmem_limit = int(min(max(32 << 20, 2 * est), 96 << 20))

    out = pl.pallas_call(
        head_kernel,
        out_shape=jax.ShapeDtypeStruct((B, Lp), features.dtype),
        grid=grid,
        in_specs=[
            pl.BlockSpec((tb, D), lambda i: (i, 0)),            # x: tiled over rows
            pl.BlockSpec((D, Dp), lambda i: (0, 0),
                         pipeline_mode=pl.Buffered(1)),          # W1: resident
            pl.BlockSpec((2, Wb), lambda i: (0, 0),
                         pipeline_mode=pl.Buffered(1)),          # packed biases
            pl.BlockSpec((Dp, Lp), lambda i: (0, 0),
                         pipeline_mode=pl.Buffered(1)),          # W2: resident
        ],
        out_specs=pl.BlockSpec((tb, Lp), lambda i: (i, 0)),
        compiler_params=pltpu.CompilerParams(
            dimension_semantics=("parallel",),
            vmem_limit_bytes=vmem_limit),
    )(features, w1_p, bias, w2_p)

    return out[:, :num_labels]


if __name__ == "__main__":
    # Synthetic config: hidden_size=28, num_extra_dims=4 -> total_dims=32, num_labels=8
    batch = 8
    hidden_size = 28
    num_extra_dims = 4
    total_dims = hidden_size + num_extra_dims
    num_labels = 8

    key = jax.random.PRNGKey(0)
    k_x, k_w1, k_b1, k_w2, k_b2 = jax.random.split(key, 5)

    features = jax.random.normal(k_x, (batch, total_dims), dtype=jnp.float32)
    # Deterministic parameter init (scaled normal, roughly nn.Linear default scale).
    w1 = jax.random.normal(k_w1, (total_dims, total_dims), dtype=jnp.float32) * (1.0 / total_dims ** 0.5)
    b1 = jax.random.normal(k_b1, (1, total_dims), dtype=jnp.float32) * 0.01
    w2 = jax.random.normal(k_w2, (total_dims, num_labels), dtype=jnp.float32) * (1.0 / total_dims ** 0.5)
    b2 = jax.random.normal(k_b2, (1, num_labels), dtype=jnp.float32) * 0.01

    # One-time parameter prep (padding + bias packing hoisted out of the hot path).
    w1_p, bias, w2_p = prep_params(w1, b1, w2, b2)

    out = classification_head_relu(features, w1_p, bias, w2_p, num_labels)
    out = jax.block_until_ready(out)

    # Pure-JAX reference check.
    ref = jnp.maximum(features @ w1 + b1, 0.0) @ w2 + b2
    assert out.shape == (batch, num_labels)
    assert jnp.allclose(out, ref, atol=1e-5, rtol=1e-5)

    print("KERNEL_OK")
</pallas_src>

<mosaic_0001>
module attributes {stable_mosaic.version = 11 : i64} {
  func.func @head_kernel(%arg0: i32, %arg1: memref<8x32xf32, #tpu.memory_space<vmem>>, %arg2: memref<32x128xf32, #tpu.memory_space<vmem>>, %arg3: memref<2x128xf32, #tpu.memory_space<vmem>>, %arg4: memref<128x128xf32, #tpu.memory_space<vmem>>, %arg5: memref<8x128xf32, #tpu.memory_space<vmem>>) attributes {dimension_semantics = [#tpu.dimension_semantics<parallel>], iteration_bounds = array<i64: 1>, scalar_prefetch = 0 : i64, scratch_operands = 0 : i64, tpu.core_type = #tpu.core_type<tc>, window_params = [{transform_indices = @transform_0, window_bounds = array<i64: 8, 32>}, {pipeline_mode = #tpu.pipeline_mode<synchronous>, transform_indices = @transform_1, window_bounds = array<i64: 32, 128>}, {pipeline_mode = #tpu.pipeline_mode<synchronous>, transform_indices = @transform_2, window_bounds = array<i64: 2, 128>}, {pipeline_mode = #tpu.pipeline_mode<synchronous>, transform_indices = @transform_3, window_bounds = array<i64: 128, 128>}, {transform_indices = @transform_4, window_bounds = array<i64: 8, 128>}]} {
    %c0 = arith.constant 0 : index
    %c0_0 = arith.constant 0 : index
    %0 = vector.load %arg1[%c0, %c0_0] : memref<8x32xf32, #tpu.memory_space<vmem>>, vector<8x32xf32>
    %c0_1 = arith.constant 0 : index
    %c0_2 = arith.constant 0 : index
    %1 = vector.load %arg2[%c0_1, %c0_2] : memref<32x128xf32, #tpu.memory_space<vmem>>, vector<32x128xf32>
    %cst = arith.constant dense<0.000000e+00> : vector<8x128xf32>
    %2 = tpu.matmul %0, %1, %cst {dimension_numbers = #tpu.dot_dimension_numbers<[1], [0], [0], [1], [0, 0, 1, 1], [], []>} : vector<8x32xf32>, vector<32x128xf32>, vector<8x128xf32> -> vector<8x128xf32>
    %c0_3 = arith.constant 0 : index
    %c0_4 = arith.constant 0 : index
    %3 = vector.load %arg3[%c0_3, %c0_4] : memref<2x128xf32, #tpu.memory_space<vmem>>, vector<1x128xf32>
    %4 = vector.broadcast %3 : vector<1x128xf32> to vector<8x128xf32>
    %5 = arith.addf %2, %4 : vector<8x128xf32>
    %cst_5 = arith.constant 0.000000e+00 : f32
    %6 = vector.broadcast %cst_5 : f32 to vector<8x128xf32>
    %7 = arith.maximumf %5, %6 : vector<8x128xf32>
    %c0_6 = arith.constant 0 : index
    %c0_7 = arith.constant 0 : index
    %8 = vector.load %arg4[%c0_6, %c0_7] : memref<128x128xf32, #tpu.memory_space<vmem>>, vector<128x128xf32>
    %cst_8 = arith.constant dense<0.000000e+00> : vector<8x128xf32>
    %9 = tpu.matmul %7, %8, %cst_8 {dimension_numbers = #tpu.dot_dimension_numbers<[1], [0], [0], [1], [0, 0, 1, 1], [], []>} : vector<8x128xf32>, vector<128x128xf32>, vector<8x128xf32> -> vector<8x128xf32>
    %c1 = arith.constant 1 : index
    %c0_9 = arith.constant 0 : index
    %10 = vector.load %arg3[%c1, %c0_9] : memref<2x128xf32, #tpu.memory_space<vmem>>, vector<1x128xf32>
    %11 = vector.broadcast %10 : vector<1x128xf32> to vector<8x128xf32>
    %12 = arith.addf %9, %11 : vector<8x128xf32>
    %c0_10 = arith.constant 0 : index
    %c0_11 = arith.constant 0 : index
    %13 = vector.load %arg5[%c0_10, %c0_11] : memref<8x128xf32, #tpu.memory_space<vmem>>, vector<8x128xf32>
    tpu.vector_store %arg5[%c0_10, %c0_11], %12 {strides = array<i32>} : memref<8x128xf32, #tpu.memory_space<vmem>>, vector<8x128xf32>,
    return
  }
  func.func @transform_0(%arg0: i32) -> (i32, i32) {
    %c0_i32 = arith.constant 0 : i32
    %c0_i32_0 = arith.constant 0 : i32
    return %arg0, %c0_i32 : i32, i32
  }
  func.func @transform_1(%arg0: i32) -> (i32, i32) {
    %c0_i32 = arith.constant 0 : i32
    %c0_i32_0 = arith.constant 0 : i32
    %c0_i32_1 = arith.constant 0 : i32
    return %c0_i32, %c0_i32_0 : i32, i32
  }
  func.func @transform_2(%arg0: i32) -> (i32, i32) {
    %c0_i32 = arith.constant 0 : i32
    %c0_i32_0 = arith.constant 0 : i32
    %c0_i32_1 = arith.constant 0 : i32
    return %c0_i32, %c0_i32_0 : i32, i32
  }
  func.func @transform_3(%arg0: i32) -> (i32, i32) {
    %c0_i32 = arith.constant 0 : i32
    %c0_i32_0 = arith.constant 0 : i32
    %c0_i32_1 = arith.constant 0 : i32
    return %c0_i32, %c0_i32_0 : i32, i32
  }
  func.func @transform_4(%arg0: i32) -> (i32, i32) {
    %c0_i32 = arith.constant 0 : i32
    %c0_i32_0 = arith.constant 0 : i32
    return %arg0, %c0_i32 : i32, i32
  }
}

</mosaic_0001>

<bundles_post_ra>
// kernel: tpu_custom_call.1
= control target key start
LH: loop header
LB: loop body
LE: loop exit
PB: predicated region body
PF: predicated region fallthrough
CT: control target
= control target key end

     0   :  { %9 = vsyncpa [#allocation3], 0  ;;  %s352_s0 = inlined_call_operand.hbm [shape: f32[8,32], index: 0, kind: input, shape index: {}]   ;;  %s353_s1 = inlined_call_operand.hbm [shape: f32[32,128], index: 1, kind: input, shape index: {}]   ;;  %s354_s2 = inlined_call_operand.hbm [shape: f32[2,128], index: 2, kind: input, shape index: {}]   ;;  %s355_s3 = inlined_call_operand.hbm [shape: f32[128,128], index: 3, kind: input, shape index: {}]   ;;  %s356_s4 = inlined_call_operand.hbm [shape: f32[8,128], index: 4, kind: output, shape index: {}]  }
   0x1   :  { %10 = vsyncpa [#allocation6], 0 }
   0x2   :  { %11 = vsyncpa [#allocation9], 0  ;;  %s28_s17 = sshll.u32 %s353_s1, 4  ;;  %s29_s17 = int_to_ptr.hbm [resolvable:$true] %s28_s17 }
   0x3   :  { %12 = vsyncpa [#allocation4], 0  ;;  %s305_s18 = smov [#allocation5]   ;;  %s18_s22 = sshll.u32 %s352_s0, 4  ;;  %s19_s22 = int_to_ptr.hbm [resolvable:$true] %s18_s22 }
   0x4   :  { %s30_s19 = sshll.u32 %s305_s18, 4  ;;  %s306_s23 = smov 128   ;;  %s31_s19 = int_to_ptr.vmem [resolvable:$true] %s30_s19 }
   0x5   :  { %s307_s24 = smov 8   ;;  %s308_s25 = smov [#allocation2]  }
   0x6   :  { %36 = dma.hbm_to_vmem [thread:$0]  %s29_s17, 512, %s31_s19, [#allocation6], %s306_s23, %s306_s23, %s307_s24  }
   0x7   :  { %s20_s26 = sshll.u32 %s308_s25, 4  ;;  %s42_s29 = sshll.u32 %s354_s2, 4  ;;  %s21_s26 = int_to_ptr.vmem [resolvable:$true] %s20_s26  ;;  %s43_s29 = int_to_ptr.hbm [resolvable:$true] %s42_s29 }
   0x8   :  { %23 = dma.hbm_to_vmem [thread:$0]  %s19_s22, 128, %s21_s26, [#allocation3]  }
   0x9   :  { %s52_s5 = sshll.u32 %s355_s3, 4  ;;  %s309_s6 = smov [#allocation7]   ;;  %s53_s5 = int_to_ptr.hbm [resolvable:$true] %s52_s5 }
   0xa   :  { %s44_s7 = sshll.u32 %s309_s6, 4  ;;  %s310_s0 = smov [#allocation8]   ;;  %s45_s7 = int_to_ptr.vmem [resolvable:$true] %s44_s7 }
   0xb   :  { %47 = dma.hbm_to_vmem [thread:$0]  %s43_s29, 32, %s45_s7, [#allocation6]  }
   0xc   :  { %s54_s8 = sshll.u32 %s310_s0, 4  ;;  %s55_s8 = int_to_ptr.vmem [resolvable:$true] %s54_s8 }
   0xd   :  { %60 = dma.hbm_to_vmem [thread:$0]  %s53_s5, 2048, %s55_s8, [#allocation9], %s306_s23, %s306_s23, %s307_s24  }
   0xe   :  { %297 = dma.done.wait [#allocation3], 128  }
   0xf   :  { %298 = vsyncadd [#allocation3], 4294967168 }
  0x10   :  { %299 = dma.done.wait [#allocation6], 544  }
  0x11   :  { %300 = vsyncadd [#allocation6], 4294966752 }
  0x12   :  { %301 = dma.done.wait [#allocation9], 2048  }
  0x13   :  { %302 = vsyncadd [#allocation9], 4294965248  ;;  %v81_v0 = vld [vmem:[#allocation5 + $0x18] sm:$0xff]  ;;  %v80_v1 = vld [vmem:[#allocation5 + $0x10] sm:$0xff]  ;;  %vm84_vm0 = vcmask 261120   ;;  %s311_s2 = smov [#allocation10]  }
  0x14   :  { %100 = vmatpush.msra.mxu0 %v81_v0  ;;  %v124_v2 = vld [vmem:[#allocation8 + $0x78] sm:$0xff]  ;;  %v79_v3 = vld [vmem:[#allocation5 + $0x8] sm:$0xff]  ;;  %v123_v4 = vld [vmem:[#allocation8 + $0x70] sm:$0xff]  ;;  %s153_s3 = sshll.u32 %s311_s2, 4  ;;  %s155_s11 = sshll.u32 %s356_s4, 4  ;;  %s154_s3 = int_to_ptr.vmem [resolvable:$true] %s153_s3  ;;  %s156_s11 = int_to_ptr.hbm [resolvable:$true] %s155_s11 }
  0x15   :  { %127 = vmatpush.msra.mxu1 %v124_v2  ;;  %v122_v5 = vld [vmem:[#allocation8 + $0x68] sm:$0xff]  ;;  %v78_v6 = vld [vmem:[#allocation5] sm:$0xff]  ;;  %v77_v7 = vld [vmem:[#allocation2] sm:$0xff] }
  0x16   :  { %101 = vmatpush.msra.mxu0 %v80_v1  ;;  %v121_v8 = vld [vmem:[#allocation8 + $0x60] sm:$0xff]  ;;  %v120_v9 = vld [vmem:[#allocation8 + $0x58] sm:$0xff]  ;;  %v119_v10 = vld [vmem:[#allocation8 + $0x50] sm:$0xff] }
  0x17   :  { %128 = vmatpush.msra.mxu1 %v123_v4  ;;  %v118_v11 = vld [vmem:[#allocation8 + $0x48] sm:$0xff]  ;;  %v117_v12 = vld [vmem:[#allocation8 + $0x40] sm:$0xff]  ;;  %v116_v13 = vld [vmem:[#allocation8 + $0x38] sm:$0xff] }
  0x18   :  { %102 = vmatpush.msra.mxu0 %v79_v3  ;;  %v115_v14 = vld [vmem:[#allocation8 + $0x30] sm:$0xff]  ;;  %v114_v15 = vld [vmem:[#allocation8 + $0x28] sm:$0xff]  ;;  %v113_v16 = vld [vmem:[#allocation8 + $0x20] sm:$0xff] }
  0x19   :  { %129 = vmatpush.msra.mxu1 %v122_v5  ;;  %v112_v17 = vld [vmem:[#allocation8 + $0x18] sm:$0xff]  ;;  %v111_v18 = vld [vmem:[#allocation8 + $0x10] sm:$0xff]  ;;  %v110_v19 = vld [vmem:[#allocation8 + $0x8] sm:$0xff] }
  0x1a   :  { %103 = vmatpush.msra.mxu0 %v78_v6  ;;  %v109_v20 = vld [vmem:[#allocation8] sm:$0xff]  ;;  %v175_v21 = vld [vmem:[#allocation7] ss:$0 sm:$0xff]  ;;  %v176_v25 = vld [vmem:[#allocation7 + $0x1] ss:$0 sm:$0xff] }
  0x1b   :  { %167 = vmatmul.msk.f32.vlgmr.msra.gmra.mxu0 %vm84_vm0, %v77_v7  ;;  %130 = vmatpush.msra.mxu1 %v121_v8 }
  0x1d   :  { %131 = vmatpush.msra.mxu1 %v120_v9 }
  0x1f   :  { %132 = vmatpush.msra.mxu1 %v119_v10 }
  0x21   :  { %133 = vmatpush.msra.mxu1 %v118_v11 }
  0x23   :  { %134 = vmatpush.msra.mxu1 %v117_v12 }
  0x25   :  { %135 = vmatpush.msra.mxu1 %v116_v13 }
  0x27   :  { %136 = vmatpush.msra.mxu1 %v115_v14 }
  0x29   :  { %137 = vmatpush.msra.mxu1 %v114_v15 }
  0x2b   :  { %138 = vmatpush.msra.mxu1 %v113_v16 }
  0x2d   :  { %139 = vmatpush.msra.mxu1 %v112_v17 }
  0x2f   :  { %140 = vmatpush.msra.mxu1 %v111_v18 }
  0x31   :  { %141 = vmatpush.msra.mxu1 %v110_v19 }
  0x33   :  { %142 = vmatpush.msra.mxu1 %v109_v20 }
  0x98   :  { %v105_v22 = vpop.f32.mrf.mxu0 }
  0x99   :  { %v106_v23 = vadd.f32 %v175_v21, %v105_v22 }
  0x9b   :  { %v108_v24 = vmax.f32 %v106_v23, 0.0 }
  0x9d   :  { %143 = vmatmul.f32.vlgmr.msra.gmra.mxu1 %v108_v24 }
 0x11a   :  { %v144_v26 = vpop.f32.mrf.mxu1 }
 0x11b   :  { %v145_v27 = vadd.f32 %v176_v25, %v144_v26 }
 0x11d   :  { %147 = vst [vmem:[#allocation10] sm:$0xff] %v145_v27 }
 0x11e   :  { %158 = dma.vmem_to_hbm [thread:$0]  %s154_s3, 128, %s156_s11, [#allocation4]  }
 0x11f   :  { %303 = dma.done.wait [#allocation4], 128  }
 0x120   :  { %304 = vsyncadd [#allocation4], 4294967168 }
 0x121   :  { %163 = vsyncpa [#allocation3], 1 }
 0x122   :  { %164 = vsyncpa [#allocation6], 1 }
 0x123   :  { %165 = vsyncpa [#allocation9], 1 }
 0x124   :  { %166 = vsyncpa [#allocation4], 1 }

</bundles_post_ra>
